<compile_context>
chip_gen: v6e
topology: v6e:2x2x1
jax: 0.10.0
libtpu: 0.0.40
codegen_flags: <defaults>
</compile_context>

<pallas_src>
import jax
import jax.numpy as jnp
from jax.experimental import pallas as pl
from jax.experimental.pallas import tpu as pltpu

# ----------------------------- model sizes ---------------------------------
H = 8            # horizon
T = 4            # transition dim
DIN = H * T      # flattened trajectory features (32)
E = 32           # sinusoidal time-embedding dim
DCAT = DIN + E   # fused first-layer contraction dim (64)
HID = 128        # hidden width (full lane width)
NOUT = 128       # lane-dense padded output width (real value lives in col 0)
TILE_B = 128     # batch rows per grid step


# ----------------------------- Pallas kernel -------------------------------
def value_mlp_kernel(xt_ref, w1_ref, b1_ref, w2_ref, out_ref):
    """h = mish(xt @ W1 + b1);  out = h @ W2pad   (column 0 is the value)."""
    # Single fused first-layer matmul: xt = [x_flat | temb], W1 = [Wx; Wt].
    h = (jnp.dot(xt_ref[...], w1_ref[...], preferred_element_type=jnp.float32)
         + b1_ref[...])                                    # (TILE_B, HID) f32

    # Mish: h * tanh(softplus(h)); numerically stable softplus (no exp overflow).
    sp = jnp.maximum(h, 0.0) + jnp.log1p(jnp.exp(-jnp.abs(h)))
    h = h * jnp.tanh(sp)

    # Lane-dense output head: W2 is zero-padded to NOUT=128 columns so the
    # store is a full-width, unmasked vst.
    out_ref[...] = jnp.dot(h.astype(w2_ref.dtype), w2_ref[...],
                           preferred_element_type=jnp.float32)  # (TILE_B, NOUT)


def value_model_pallas(xt, w1, b1, w2_pad):
    """xt: (Bp, DCAT) bf16 with Bp % TILE_B == 0.  Returns (Bp, NOUT) f32."""
    bp = xt.shape[0]
    grid = (bp // TILE_B,)
    return pl.pallas_call(
        value_mlp_kernel,
        out_shape=jax.ShapeDtypeStruct((bp, NOUT), jnp.float32),
        grid_spec=pltpu.PrefetchScalarGridSpec(
            num_scalar_prefetch=0,
            grid=grid,
            in_specs=[
                pl.BlockSpec((TILE_B, DCAT), lambda i: (i, 0)),  # per-tile rows
                pl.BlockSpec((DCAT, HID), lambda i: (0, 0)),     # W1: VMEM-resident
                pl.BlockSpec((1, HID), lambda i: (0, 0)),        # b1: VMEM-resident
                pl.BlockSpec((HID, NOUT), lambda i: (0, 0)),     # W2: VMEM-resident
            ],
            out_specs=pl.BlockSpec((TILE_B, NOUT), lambda i: (i, 0)),
        ),
        compiler_params=pltpu.CompilerParams(
            dimension_semantics=("parallel",)),
    )(xt, w1, b1, w2_pad)


# ----------------------------- JAX glue ------------------------------------
def sinusoidal_time_embedding(t, dim):
    """Standard sinusoidal embedding of timestep t (B,) -> (B, dim)."""
    half = dim // 2
    freqs = jnp.exp(-jnp.log(10000.0) * jnp.arange(half, dtype=jnp.float32)
                    / (half - 1))
    args = t.astype(jnp.float32)[:, None] * freqs[None, :]
    return jnp.concatenate([jnp.sin(args), jnp.cos(args)], axis=-1)


def make_params(key):
    k1, k2, k3 = jax.random.split(key, 3)
    wx = jax.random.normal(k1, (DIN, HID), jnp.float32) * (1.0 / jnp.sqrt(DIN))
    wt = jax.random.normal(k2, (E, HID), jnp.float32) * (1.0 / jnp.sqrt(E))
    w1 = jnp.concatenate([wx, wt], axis=0)                 # stacked (DCAT, HID)
    b1 = jnp.zeros((1, HID), jnp.float32)
    w2 = jax.random.normal(k3, (HID, 1), jnp.float32) * (1.0 / jnp.sqrt(HID))
    w2_pad = jnp.pad(w2, ((0, 0), (0, NOUT - 1)))          # (HID, NOUT), col 0 live
    b2 = jnp.float32(0.1)                                  # folded in wrapper
    return w1.astype(jnp.bfloat16), b1, w2_pad.astype(jnp.bfloat16), b2


@jax.jit
def value_guide_forward(x, cond, t, w1, b1, w2_pad, b2):
    """ValueGuide.forward: model(x, cond, t).squeeze(dim=-1) -> (B,)."""
    del cond  # value model ignores conditioning, as in diffuser
    b = x.shape[0]
    x_flat = x.reshape(b, -1)                              # (B, DIN)
    temb = sinusoidal_time_embedding(t, E)                 # (B, E)
    xt = jnp.concatenate([x_flat, temb], axis=-1)          # (B, DCAT) fused-K input
    xt = xt.astype(jnp.bfloat16)
    pad = (-b) % TILE_B
    if pad:
        xt = jnp.pad(xt, ((0, pad), (0, 0)))
    out = value_model_pallas(xt, w1, b1, w2_pad)           # (Bp, NOUT) f32
    # Column 0 of the lane-dense output == model(x,cond,t).squeeze(-1); add b2 here.
    return out[:b, 0] + b2


def value_guide_forward_reference(x, cond, t, w1, b1, w2_pad, b2):
    """Pure-JAX reference of the same model (same dtype strategy)."""
    del cond
    b = x.shape[0]
    x_flat = x.reshape(b, -1)
    temb = sinusoidal_time_embedding(t, E)
    xt = jnp.concatenate([x_flat, temb], axis=-1).astype(jnp.bfloat16)
    h = jnp.dot(xt, w1, preferred_element_type=jnp.float32) + b1
    sp = jnp.maximum(h, 0.0) + jnp.log1p(jnp.exp(-jnp.abs(h)))
    h = h * jnp.tanh(sp)
    y = jnp.dot(h.astype(jnp.bfloat16), w2_pad, preferred_element_type=jnp.float32)
    return y[:, 0] + b2


# TODO(synk): ValueGuide.gradients uses torch.autograd.grad; a JAX equivalent
# needs jax.grad over this forward (custom_vjp / backward Pallas kernel) —
# forward semantics only here.

if __name__ == "__main__":
    key = jax.random.PRNGKey(0)
    kx, kt, kp = jax.random.split(key, 3)

    # ValueGuide scores many candidate trajectories per guided diffusion step;
    # B=256 gives a real (2-step) batch grid while staying small.
    B = 256
    x = jax.random.normal(kx, (B, H, T), jnp.float32)      # (B, horizon, transition)
    t = jax.random.randint(kt, (B,), 0, 100, jnp.int32)
    cond = {0: jnp.zeros((B, T), jnp.float32)}             # present but unused
    w1, b1, w2_pad, b2 = make_params(kp)

    y = value_guide_forward(x, cond, t, w1, b1, w2_pad, b2)
    y = jax.block_until_ready(y)

    y_ref = value_guide_forward_reference(x, cond, t, w1, b1, w2_pad, b2)
    assert y.shape == (B,), y.shape
    assert jnp.max(jnp.abs(y - y_ref)) < 1e-2, (y, y_ref)

    print("KERNEL_OK")
</pallas_src>

<mosaic_0001>
module attributes {stable_mosaic.version = 11 : i64} {
  func.func @value_mlp_kernel(%arg0: i32, %arg1: memref<128x64xbf16, #tpu.memory_space<vmem>>, %arg2: memref<64x128xbf16, #tpu.memory_space<vmem>>, %arg3: memref<1x128xf32, #tpu.memory_space<vmem>>, %arg4: memref<128x128xbf16, #tpu.memory_space<vmem>>, %arg5: memref<128x128xf32, #tpu.memory_space<vmem>>) attributes {dimension_semantics = [#tpu.dimension_semantics<parallel>], iteration_bounds = array<i64: 2>, scalar_prefetch = 0 : i64, scratch_operands = 0 : i64, tpu.core_type = #tpu.core_type<tc>, window_params = [{transform_indices = @transform_0, window_bounds = array<i64: 128, 64>}, {pipeline_mode = #tpu.pipeline_mode<synchronous>, transform_indices = @transform_1, window_bounds = array<i64: 64, 128>}, {pipeline_mode = #tpu.pipeline_mode<synchronous>, transform_indices = @transform_2, window_bounds = array<i64: 1, 128>}, {pipeline_mode = #tpu.pipeline_mode<synchronous>, transform_indices = @transform_3, window_bounds = array<i64: 128, 128>}, {transform_indices = @transform_4, window_bounds = array<i64: 128, 128>}]} {
    %c0 = arith.constant 0 : index
    %c0_0 = arith.constant 0 : index
    %0 = vector.load %arg1[%c0, %c0_0] : memref<128x64xbf16, #tpu.memory_space<vmem>>, vector<128x64xbf16>
    %c0_1 = arith.constant 0 : index
    %c0_2 = arith.constant 0 : index
    %1 = vector.load %arg2[%c0_1, %c0_2] : memref<64x128xbf16, #tpu.memory_space<vmem>>, vector<64x128xbf16>
    %cst = arith.constant dense<0.000000e+00> : vector<128x128xf32>
    %2 = tpu.matmul %0, %1, %cst {dimension_numbers = #tpu.dot_dimension_numbers<[1], [0], [0], [1], [0, 0, 1, 1], [], []>} : vector<128x64xbf16>, vector<64x128xbf16>, vector<128x128xf32> -> vector<128x128xf32>
    %c0_3 = arith.constant 0 : index
    %c0_4 = arith.constant 0 : index
    %3 = vector.load %arg3[%c0_3, %c0_4] : memref<1x128xf32, #tpu.memory_space<vmem>>, vector<1x128xf32>
    %4 = vector.broadcast %3 : vector<1x128xf32> to vector<128x128xf32>
    %5 = arith.addf %2, %4 : vector<128x128xf32>
    %cst_5 = arith.constant 0.000000e+00 : f32
    %6 = vector.broadcast %cst_5 : f32 to vector<128x128xf32>
    %7 = arith.maximumf %5, %6 : vector<128x128xf32>
    %8 = math.absf %5 : vector<128x128xf32>
    %cst_6 = arith.constant 0.000000e+00 : f32
    %9 = vector.broadcast %cst_6 : f32 to vector<128x128xf32>
    %10 = arith.subf %9, %8 : vector<128x128xf32>
    %11 = math.exp %10 : vector<128x128xf32>
    %12 = math.log1p %11 : vector<128x128xf32>
    %13 = arith.addf %7, %12 : vector<128x128xf32>
    %14 = math.tanh %13 : vector<128x128xf32>
    %15 = arith.mulf %5, %14 : vector<128x128xf32>
    %16 = arith.truncf %15 : vector<128x128xf32> to vector<128x128xbf16>
    %c0_7 = arith.constant 0 : index
    %c0_8 = arith.constant 0 : index
    %17 = vector.load %arg4[%c0_7, %c0_8] : memref<128x128xbf16, #tpu.memory_space<vmem>>, vector<128x128xbf16>
    %cst_9 = arith.constant dense<0.000000e+00> : vector<128x128xf32>
    %18 = tpu.matmul %16, %17, %cst_9 {dimension_numbers = #tpu.dot_dimension_numbers<[1], [0], [0], [1], [0, 0, 1, 1], [], []>} : vector<128x128xbf16>, vector<128x128xbf16>, vector<128x128xf32> -> vector<128x128xf32>
    %c0_10 = arith.constant 0 : index
    %c0_11 = arith.constant 0 : index
    %19 = vector.load %arg5[%c0_10, %c0_11] : memref<128x128xf32, #tpu.memory_space<vmem>>, vector<128x128xf32>
    tpu.vector_store %arg5[%c0_10, %c0_11], %18 {strides = array<i32>} : memref<128x128xf32, #tpu.memory_space<vmem>>, vector<128x128xf32>,
    return
  }
  func.func @transform_0(%arg0: i32) -> (i32, i32) {
    %c0_i32 = arith.constant 0 : i32
    %c0_i32_0 = arith.constant 0 : i32
    return %arg0, %c0_i32 : i32, i32
  }
  func.func @transform_1(%arg0: i32) -> (i32, i32) {
    %c0_i32 = arith.constant 0 : i32
    %c0_i32_0 = arith.constant 0 : i32
    %c0_i32_1 = arith.constant 0 : i32
    return %c0_i32, %c0_i32_0 : i32, i32
  }
  func.func @transform_2(%arg0: i32) -> (i32, i32) {
    %c0_i32 = arith.constant 0 : i32
    %c0_i32_0 = arith.constant 0 : i32
    %c0_i32_1 = arith.constant 0 : i32
    return %c0_i32, %c0_i32_0 : i32, i32
  }
  func.func @transform_3(%arg0: i32) -> (i32, i32) {
    %c0_i32 = arith.constant 0 : i32
    %c0_i32_0 = arith.constant 0 : i32
    %c0_i32_1 = arith.constant 0 : i32
    return %c0_i32, %c0_i32_0 : i32, i32
  }
  func.func @transform_4(%arg0: i32) -> (i32, i32) {
    %c0_i32 = arith.constant 0 : i32
    %c0_i32_0 = arith.constant 0 : i32
    return %arg0, %c0_i32 : i32, i32
  }
}

</mosaic_0001>

<bundles_post_ra>
// kernel: value_guide_forward.1
= control target key start
LH: loop header
LB: loop body
LE: loop exit
PB: predicated region body
PF: predicated region fallthrough
CT: control target
= control target key end

     0   :  { %s1229_s15 = smov 0   ;;  %s1555_s0 = inlined_call_operand.vmem [shape: bf16[256,64], index: 0, kind: input, shape index: {}]   ;;  %s1556_s1 = inlined_call_operand.vmem [shape: bf16[64,128], index: 1, kind: input, shape index: {}]   ;;  %s1557_s2 = inlined_call_operand.vmem [shape: f32[1,128], index: 2, kind: input, shape index: {}]   ;;  %s1558_s3 = inlined_call_operand.vmem [shape: bf16[128,128], index: 3, kind: input, shape index: {}]   ;;  %s1559_s4 = inlined_call_operand.vmem [shape: f32[256,128], index: 4, kind: output, shape index: {}]  }
   0x1 LB: > { %s932_s16 = sadd.s32 4294967295, %s1202_s15   ;;  %p936_p0 = scmp.ge.s32.totalorder %s1202_s15, 1  ;;  %s1202_s15 = sphi %s1229_s15, %s14_s15  }
   0x2   : > { %p163_p1 = scmp.lt.s32.totalorder %s1202_s15, 3 }
   0x4   : > { %p164_p2 = pnand %p936_p0, %p163_p1 }
   0x5   : > { %s937_s19 = sshll.u32 (!%p164_p2), %s932_s16, 4 }
   0x6   : > { %167 = sbr.rel (%p164_p2) target bundleno = 541 (0x21d), region = 36  ;;  %p190_p3 = scmp.lt.s32.totalorder (!%p164_p2), %s937_s19, 31 }
   0xb   : > { %v1080_v0 = vld [vmem:[%s1556_s1 + $0x18] sm:$0xff]   ;;  %v1081_v1 = vld [vmem:[%s1556_s1 + $0x10] sm:$0xff]   ;;  %v1082_v2 = vld [vmem:[%s1556_s1 + $0x8] sm:$0xff]   ;;  %s1581_s19 = smov (!%p190_p3, %s937_s19), 31  ;;  %vm297_vm0 = vcmask 523264  }
   0xc   : > { %1000 = vmatprep.subr.bf16.mxu0 %v1080_v0  ;;  %s938_s24 = sshll.u32 %s1581_s19, 2  ;;  %v1083_v4 = vld [vmem:[%s1556_s1] sm:$0xff]   ;;  %v1092_v12 = vld [vmem:[%s1558_s3 + $0x38] sm:$0xff]   ;;  %v1093_v13 = vld [vmem:[%s1558_s3 + $0x30] sm:$0xff]  }
   0xd   : > { %1001 = vmatpush3.bf16.msra.mxu0 %v1080_v0  ;;  %s193_s27 = scalar_lea.vmem %s1555_s0, %s938_s24  ;;  %1056 = vmatprep.subr.bf16.mxu1 %v1092_v12  ;;  %v1094_v14 = vld [vmem:[%s1558_s3 + $0x28] sm:$0xff]   ;;  %v1095_v15 = vld [vmem:[%s1558_s3 + $0x20] sm:$0xff]   ;;  %v1096_v16 = vld [vmem:[%s1558_s3 + $0x18] sm:$0xff]   ;;  %s940_s24 = sshll.u32 %s1581_s19, 3 }
   0xe   : > { %1002 = vmatprep.subr.bf16.mxu0 %v1081_v1  ;;  %v1084_v3 = vld [vmem:[%s193_s27] sm:$0xff]   ;;  %v1085_v5 = vld [vmem:[%s193_s27 + $0x8] sm:$0xff]   ;;  %v1086_v6 = vld [vmem:[%s193_s27 + $0x10] sm:$0xff]   ;;  %1064 = vmatpush3.bf16.msra.mxu1 %v1092_v12 }
   0xf   : > { %1008 = vmatprep.mubr.msk.bf16.mxu0 %vm297_vm0, %v1084_v3  ;;  %v1087_v7 = vld [vmem:[%s193_s27 + $0x18] sm:$0xff]   ;;  %v1088_v8 = vld [vmem:[%s193_s27 + $0x20] sm:$0xff]   ;;  %v1089_v9 = vld [vmem:[%s193_s27 + $0x28] sm:$0xff]   ;;  %1057 = vmatprep.subr.bf16.mxu1 %v1093_v13 }
  0x10   : > { %v1090_v10 = vld [vmem:[%s193_s27 + $0x30] sm:$0xff]   ;;  %v1091_v11 = vld [vmem:[%s193_s27 + $0x38] sm:$0xff]   ;;  %v1098_v18 = vld [vmem:[%s1558_s3 + $0x8] sm:$0xff]   ;;  %s1534_s27 = scalar_lea.vmem %s1559_s4, %s940_s24 }
  0x11   : > { %1003 = vmatpush3.bf16.msra.mxu0 %v1081_v1  ;;  %v1097_v17 = vld [vmem:[%s1558_s3 + $0x10] sm:$0xff]   ;;  %v1099_v19 = vld [vmem:[%s1558_s3] sm:$0xff]  }
  0x12   : > { %1004 = vmatprep.subr.bf16.mxu0 %v1082_v2  ;;  %1065 = vmatpush3.bf16.msra.mxu1 %v1093_v13  ;;  %v1290_v20 = vld [vmem:[%s1557_s2] ss:$0 sm:$0xff] }
  0x13   : > { %1058 = vmatprep.subr.bf16.mxu1 %v1094_v14 }
  0x15   : > { %1005 = vmatpush3.bf16.msra.mxu0 %v1082_v2 }
  0x16   : > { %1006 = vmatprep.subr.bf16.mxu0 %v1083_v4  ;;  %1066 = vmatpush3.bf16.msra.mxu1 %v1094_v14 }
  0x17   : > { %1059 = vmatprep.subr.bf16.mxu1 %v1095_v15 }
  0x19   : > { %1007 = vmatpush3.bf16.msra.mxu0 %v1083_v4 }
  0x1a   : > { %1024 = vmatprep.subr.bf16.mxu0 %v1092_v12  ;;  %1067 = vmatpush3.bf16.msra.mxu1 %v1095_v15 }
  0x1b   : > { %1060 = vmatprep.subr.bf16.mxu1 %v1096_v16 }
  0x1c   : > { %1009 = vmatmul.mubr.msk.bf16.vlgmr.msra.gmra.mxu0 %vm297_vm0, %v1085_v5 }
  0x1d   : > { %1012 = vmatprep.mubr.msk.bf16.mxu0 %vm297_vm0, %v1086_v6  ;;  %1025 = vmatpush3.bf16.msra.mxu0 %v1092_v12 }
  0x1e   : > { %1026 = vmatprep.subr.bf16.mxu0 %v1093_v13  ;;  %1068 = vmatpush3.bf16.msra.mxu1 %v1096_v16 }
  0x1f   : > { %1061 = vmatprep.subr.bf16.mxu1 %v1097_v17 }
  0x21   : > { %1027 = vmatpush3.bf16.msra.mxu0 %v1093_v13 }
  0x22   : > { %1028 = vmatprep.subr.bf16.mxu0 %v1094_v14  ;;  %1069 = vmatpush3.bf16.msra.mxu1 %v1097_v17 }
  0x23   : > { %1062 = vmatprep.subr.bf16.mxu1 %v1098_v18 }
  0x24   : > { %1013 = vmatmul.mubr.msk.bf16.gmra.mxu0 %vm297_vm0, %v1087_v7 }
  0x25   : > { %1016 = vmatprep.mubr.msk.bf16.mxu0 %vm297_vm0, %v1088_v8  ;;  %1029 = vmatpush3.bf16.msra.mxu0 %v1094_v14 }
  0x26   : > { %1030 = vmatprep.subr.bf16.mxu0 %v1095_v15  ;;  %1070 = vmatpush3.bf16.msra.mxu1 %v1098_v18 }
  0x27   : > { %1063 = vmatprep.subr.bf16.mxu1 %v1099_v19 }
  0x29   : > { %1031 = vmatpush3.bf16.msra.mxu0 %v1095_v15 }
  0x2a   : > { %1032 = vmatprep.subr.bf16.mxu0 %v1096_v16  ;;  %1071 = vmatpush3.bf16.msra.mxu1 %v1099_v19 }
  0x2c   : > { %1017 = vmatmul.mubr.msk.bf16.gmra.mxu0 %vm297_vm0, %v1089_v9 }
  0x2d   : > { %1020 = vmatprep.mubr.msk.bf16.mxu0 %vm297_vm0, %v1090_v10  ;;  %1033 = vmatpush3.bf16.msra.mxu0 %v1096_v16 }
  0x2e   : > { %1034 = vmatprep.subr.bf16.mxu0 %v1097_v17 }
  0x31   : > { %1035 = vmatpush3.bf16.msra.mxu0 %v1097_v17 }
  0x32   : > { %1036 = vmatprep.subr.bf16.mxu0 %v1098_v18 }
  0x34   : > { %1021 = vmatmul.mubr.msk.bf16.gmra.mxu0 %vm297_vm0, %v1091_v11 }
  0x35   : > { %1037 = vmatpush3.bf16.msra.mxu0 %v1098_v18 }
  0x36   : > { %1038 = vmatprep.subr.bf16.mxu0 %v1099_v19 }
  0x39   : > { %1039 = vmatpush3.bf16.msra.mxu0 %v1099_v19 }
  0xdc   : > { %v1010_v21 = vpop.f32.mrf.mxu0 }
  0xdd   : > { %v1293_v22 = vadd.f32 %v1010_v21, %v1290_v20 }
  0xde   : > { %v356_v23 = vpop.f32.mrf.mxu0 }
  0xdf   : > { %v437_v24 = vand.u32 2147483647, %v1293_v22  ;;  %v1297_v25 = vadd.f32 %v1290_v20, %v356_v23  ;;  %v421_v18 = vmax.f32 %v1293_v22, 0.0 }
  0xe0   : > { %v1011_v26 = vpop.f32.mrf.mxu0 }
  0xe1   : > { %v453_v27 = vsub.f32 0.0, %v437_v24  ;;  %v435_v28 = vand.u32 2147483647, %v1297_v25  ;;  %v1301_v29 = vadd.f32 %v1011_v26, %v1290_v20  ;;  %v419_v19 = vmax.f32 %v1297_v25, 0.0 }
  0xe2   : > { %v359_v30 = vpop.f32.mrf.mxu0 }
  0xe3   : > { %v471_v31 = vmul.f32 1.442695, %v453_v27  ;;  %v451_v32 = vsub.f32 0.0, %v435_v28  ;;  %v438_v33 = vand.u32 2147483647, %v1301_v29  ;;  %v1305_v34 = vadd.f32 %v1290_v20, %v359_v30 }
  0xe4   : > { %v1014_v35 = vpop.f32.mrf.mxu0  ;;  %v422_v21 = vmax.f32 %v1301_v29, 0.0 }
  0xe5   : > { %1100 = vpow2.f32 %v471_v31  ;;  %v467_v36 = vmul.f32 1.442695, %v451_v32  ;;  %v454_v37 = vsub.f32 0.0, %v438_v33  ;;  %v1308_v38 = vadd.f32 %v1014_v35, %v1290_v20 }
  0xe6   : > { %v436_v39 = vand.u32 2147483647, %v1305_v34  ;;  %v372_v40 = vpop.f32.mrf.mxu0  ;;  %v420_v26 = vmax.f32 %v1305_v34, 0.0 }
  0xe7   : > { %1102 = vpow2.f32 %v467_v36  ;;  %v473_v41 = vmul.f32 1.442695, %v454_v37  ;;  %v441_v42 = vand.u32 2147483647, %v1308_v38  ;;  %v1313_v44 = vadd.f32 %v1290_v20, %v372_v40 }
  0xe8   : > { %v452_v43 = vsub.f32 0.0, %v436_v39  ;;  %v1015_v45 = vpop.f32.mrf.mxu0  ;;  %v425_v33 = vmax.f32 %v1308_v38, 0.0 }
  0xe9   : > { %1104 = vpow2.f32 %v473_v41  ;;  %v457_v46 = vsub.f32 0.0, %v441_v42  ;;  %v1316_v47 = vadd.f32 %v1015_v45, %v1290_v20  ;;  %v439_v49 = vand.u32 2147483647, %v1313_v44 }
  0xea   : > { %v469_v48 = vmul.f32 1.442695, %v452_v43  ;;  %v375_v50 = vpop.f32.mrf.mxu0  ;;  %v423_v35 = vmax.f32 %v1313_v44, 0.0 }
  0xeb   : > { %v479_v51 = vmul.f32 1.442695, %v457_v46  ;;  %v442_v52 = vand.u32 2147483647, %v1316_v47  ;;  %v1321_v53 = vadd.f32 %v1290_v20, %v375_v50  ;;  %v455_v54 = vsub.f32 0.0, %v439_v49 }
  0xec   : > { %1106 = vpow2.f32 %v469_v48  ;;  %v1018_v55 = vpop.f32.mrf.mxu0  ;;  %v426_v39 = vmax.f32 %v1316_v47, 0.0 }
  0xed   : > { %1108 = vpow2.f32 %v479_v51  ;;  %v458_v56 = vsub.f32 0.0, %v442_v52  ;;  %v440_v57 = vand.u32 2147483647, %v1321_v53  ;;  %v475_v58 = vmul.f32 1.442695, %v455_v54 }
  0xee   : > { %v1325_v59 = vadd.f32 %v1018_v55, %v1290_v20  ;;  %v388_v60 = vpop.f32.mrf.mxu0  ;;  %v424_v40 = vmax.f32 %v1321_v53, 0.0 }
  0xef   : > { %v481_v61 = vmul.f32 1.442695, %v458_v56  ;;  %v456_v62 = vsub.f32 0.0, %v440_v57  ;;  %v1328_v63 = vadd.f32 %v1290_v20, %v388_v60  ;;  %1110 = vpow2.f32 %v475_v58 }
  0xf0   : > { %v445_v0 = vand.u32 2147483647, %v1325_v59  ;;  %v1019_v3 = vpop.f32.mrf.mxu0 }
  0xf1   : > { %1112 = vpow2.f32 %v481_v61  ;;  %v477_v1 = vmul.f32 1.442695, %v456_v62  ;;  %v443_v2 = vand.u32 2147483647, %v1328_v63  ;;  %v1333_v9 = vadd.f32 %v1019_v3, %v1290_v20 }
  0xf2   : > { %v1101_v4 = vpop.eup %1100  ;;  %v461_v5 = vsub.f32 0.0, %v445_v0  ;;  %v391_v28 = vpop.f32.mrf.mxu0 }
  0xf3   : > { %v517_v6 = vadd.f32 1.0, %v1101_v4  ;;  %1114 = vpow2.f32 %v477_v1  ;;  %v459_v8 = vsub.f32 0.0, %v443_v2  ;;  %v520_v13 = vmul.f32 -0.5, %v1101_v4 }
  0xf4   : > { %v1103_v7 = vpop.eup %1102  ;;  %v487_v12 = vmul.f32 1.442695, %v461_v5  ;;  %v446_v16 = vand.u32 2147483647, %v1333_v9  ;;  %v523_v24 = vand.u32 2147483647, %v1101_v4  ;;  %v1356_v41 = vadd.f32 %v1290_v20, %v391_v28 }
  0xf5   : > { %1116 = vlog2.f32 %v517_v6  ;;  %v499_v10 = vadd.f32 1.0, %v1103_v7  ;;  %v483_v15 = vmul.f32 1.442695, %v459_v8  ;;  %v521_v30 = vadd.f32 1.0, %v520_v13 }
  0xf6   : > { %v1335_v11 = vpop.eup %1104  ;;  %v502_v31 = vmul.f32 -0.5, %v1103_v7  ;;  %v462_v36 = vsub.f32 0.0, %v446_v16  ;;  %v505_v43 = vand.u32 2147483647, %v1103_v7  ;;  %vm1363_vm1 = vcmp.lt.f32.partialorder %v523_v24, 0.0004427343 }
  0xf7   : > { %1118 = vlog2.f32 %v499_v10  ;;  %v526_v14 = vadd.f32 1.0, %v1335_v11  ;;  %v529_v45 = vmul.f32 -0.5, %v1335_v11  ;;  %v522_v49 = vmul.f32 %v1101_v4, %v521_v30 }
  0xf8   : > { %v503_v51 = vadd.f32 1.0, %v502_v31  ;;  %v532_v55 = vand.u32 2147483647, %v1335_v11  ;;  %v489_v57 = vmul.f32 1.442695, %v462_v36 }
  0xf9   : > { %v1339_v17 = vpop.eup %1106  ;;  %1120 = vlog2.f32 %v526_v14  ;;  %v444_v61 = vand.u32 2147483647, %v1356_v41  ;;  %vm1375_vm2 = vcmp.lt.f32.partialorder %v505_v43, 0.0004427343  ;;  %v530_v1 = vadd.f32 1.0, %v529_v45 }
  0xfa   : > { %v1344_v23 = vpop.eup %1108  ;;  %v508_v27 = vadd.f32 1.0, %v1339_v17  ;;  %1122 = vpow2.f32 %v487_v12  ;;  %v511_v46 = vmul.f32 -0.5, %v1339_v17  ;;  %v514_v3 = vand.u32 2147483647, %v1339_v17 }
  0xfb   : > { %v553_v32 = vadd.f32 1.0, %v1344_v23  ;;  %1124 = vpow2.f32 %v483_v15  ;;  %v556_v56 = vmul.f32 -0.5, %v1344_v23  ;;  %v504_v5 = vmul.f32 %v1103_v7, %v503_v51  ;;  %v1022_v15 = vpop.f32.mrf.mxu0 }
  0xfc   : > { %1126 = vlog2.f32 %v508_v27  ;;  %v1351_v37 = vpop.eup %1110  ;;  %v512_v2 = vadd.f32 1.0, %v511_v46  ;;  %v559_v6 = vand.u32 2147483647, %v1344_v23  ;;  %vm1381_vm3 = vcmp.lt.f32.partialorder %v532_v55, 0.0004427343 }
  0xfd   : > { %1128 = vlog2.f32 %v553_v32  ;;  %v535_v48 = vadd.f32 1.0, %v1351_v37  ;;  %v557_v12 = vadd.f32 1.0, %v556_v56  ;;  %v538_v13 = vmul.f32 -0.5, %v1351_v37  ;;  %v404_v56 = vpop.f32.mrf.mxu0 }
  0xfe   : > { %v1358_v42 = vpop.eup %1112  ;;  %v541_v14 = vand.u32 2147483647, %v1351_v37  ;;  %v460_v27 = vsub.f32 0.0, %v444_v61  ;;  %v531_v7 = vmul.f32 %v1335_v11, %v530_v1  ;;  %v513_v30 = vmul.f32 %v1339_v17, %v512_v2 }
  0xff   : > { %v562_v52 = vadd.f32 1.0, %v1358_v42  ;;  %1130 = vlog2.f32 %v535_v48  ;;  %v565_v58 = vmul.f32 -0.5, %v1358_v42  ;;  %vm1389_vm4 = vcmp.lt.f32.partialorder %v514_v3, 0.0004427343 }
 0x100   : > { %v1368_v54 = vpop.eup %1114  ;;  %vm1400_vm5 = vcmp.lt.f32.partialorder %v559_v6, 0.0004427343  ;;  %v558_v17 = vmul.f32 %v1344_v23, %v557_v12  ;;  %v539_v51 = vadd.f32 1.0, %v538_v13  ;;  %vm1413_vm6 = vcmp.lt.f32.partialorder %v541_v14, 0.0004427343  ;;  %v1023_v6 = vpop.f32.mrf.mxu0 }
 0x101   : > { %1132 = vlog2.f32 %v562_v52  ;;  %v544_v60 = vadd.f32 1.0, %v1368_v54  ;;  %v566_v24 = vadd.f32 1.0, %v565_v58  ;;  %v547_v32 = vmul.f32 -0.5, %v1368_v54 }
 0x102   : > { %v1117_v62 = vpop.eup %1116  ;;  %v568_v52 = vand.u32 2147483647, %v1358_v42  ;;  %v550_v55 = vand.u32 2147483647, %v1368_v54  ;;  %v485_v23 = vmul.f32 1.442695, %v460_v27 }
 0x103   : > { %v519_v4 = vmul.f32 0.6931472, %v1117_v62  ;;  %1134 = vlog2.f32 %v544_v60  ;;  %v567_v60 = vmul.f32 %v1358_v42, %v566_v24  ;;  %v548_v2 = vadd.f32 1.0, %v547_v32 }
 0x104   : > { %v1119_v8 = vpop.eup %1118  ;;  %1136 = vpow2.f32 %v489_v57  ;;  %vm569_vm7 = vcmp.lt.f32.partialorder %v568_v52, 0.0004427343  ;;  %vm551_vm8 = vcmp.lt.f32.partialorder %v550_v55, 0.0004427343 }
 0x105   : > { %v501_v16 = vmul.f32 0.6931472, %v1119_v8  ;;  %v525_v43 = vsel %vm1363_vm1, %v522_v49, %v519_v4  ;;  %1138 = vpow2.f32 %v485_v23  ;;  %v1424_v4 = vadd.f32 %v1022_v15, %v1290_v20 }
 0x106   : > { %v1121_v28 = vpop.eup %1120  ;;  %v645_v62 = vadd.f32 %v525_v43, %v421_v18  ;;  %v1430_v18 = vadd.f32 %v1290_v20, %v404_v56  ;;  %v549_v43 = vmul.f32 %v1368_v54, %v548_v2 }
 0x107   : > { %v1394_v36 = vpop.eup %1122  ;;  %v507_v45 = vsel %vm1375_vm2, %v504_v5, %v501_v16  ;;  %v528_v46 = vmul.f32 0.6931472, %v1121_v28  ;;  %v449_v12 = vand.u32 2147483647, %v1424_v4  ;;  %v1441_v28 = vadd.f32 %v1023_v6, %v1290_v20 }
 0x108   : > { %v1404_v11 = vpop.eup %1124  ;;  %v643_v49 = vadd.f32 %v507_v45, %v419_v19  ;;  %v589_v3 = vadd.f32 1.0, %v1394_v36  ;;  %v447_v16 = vand.u32 2147483647, %v1430_v18 }
 0x109   : > { %v1127_v50 = vpop.eup %1126  ;;  %v534_v57 = vsel %vm1381_vm3, %v531_v7, %v528_v46  ;;  %v571_v5 = vadd.f32 1.0, %v1404_v11  ;;  %v465_v27 = vsub.f32 0.0, %v449_v12  ;;  %v540_v7 = vmul.f32 %v1351_v37, %v539_v51 }
 0x10a   : > { %v1129_v61 = vpop.eup %1128  ;;  %v646_v0 = vadd.f32 %v534_v57, %v422_v21  ;;  %v510_v1 = vmul.f32 0.6931472, %v1127_v50  ;;  %v450_v37 = vand.u32 2147483647, %v1441_v28 }
 0x10b   : > { %v555_v19 = vmul.f32 0.6931472, %v1129_v61  ;;  %v495_v52 = vmul.f32 1.442695, %v465_v27 }
 0x10c   : > { %1140 = vtanh.f32 %v646_v0  ;;  %v516_v42 = vsel %vm1389_vm4, %v513_v30, %v510_v1  ;;  %v1131_v21 = vpop.eup %1130  ;;  %v463_v30 = vsub.f32 0.0, %v447_v16 }
 0x10d   : > { %1142 = vtanh.f32 %v643_v49  ;;  %v644_v8 = vadd.f32 %v516_v42, %v420_v26  ;;  %v561_v10 = vsel %vm1400_vm5, %v558_v17, %v555_v19  ;;  %v537_v15 = vmul.f32 0.6931472, %v1131_v21 }
 0x10e   : > { %v1133_v13 = vpop.eup %1132  ;;  %1144 = vtanh.f32 %v645_v62  ;;  %v649_v14 = vadd.f32 %v561_v10, %v425_v33  ;;  %v407_v33 = vpop.f32.mrf.mxu0  ;;  %v491_v56 = vmul.f32 1.442695, %v463_v30  ;;  %v595_v10 = vand.u32 2147483647, %v1394_v36 }
 0x10f   : > { %1146 = vtanh.f32 %v644_v8  ;;  %v564_v24 = vmul.f32 0.6931472, %v1133_v13  ;;  %v543_v46 = vsel %vm1413_vm6, %v540_v7, %v537_v15  ;;  %v1456_v50 = vadd.f32 %v1290_v20, %v407_v33 }
 0x110   : > { %v1135_v26 = vpop.eup %1134  ;;  %1148 = vlog2.f32 %v589_v3  ;;  %v647_v49 = vadd.f32 %v543_v46, %v423_v35  ;;  %v592_v20 = vmul.f32 -0.5, %v1394_v36  ;;  %v574_v35 = vmul.f32 -0.5, %v1404_v11 }
 0x111   : > { %v570_v31 = vsel %vm569_vm7, %v567_v60, %v564_v24  ;;  %v546_v32 = vmul.f32 0.6931472, %v1135_v26  ;;  %1150 = vlog2.f32 %v571_v5  ;;  %v1445_v45 = vpop.eup %1136  ;;  %v448_v58 = vand.u32 2147483647, %v1456_v50 }
 0x112   : > { %v650_v48 = vadd.f32 %v570_v31, %v426_v39  ;;  %1152 = vtanh.f32 %v649_v14  ;;  %v598_v51 = vadd.f32 1.0, %v1445_v45  ;;  %v466_v39 = vsub.f32 0.0, %v450_v37  ;;  %v1460_v55 = vpop.eup %1138 }
 0x113   : > { %v552_v17 = vsel %vm551_vm8, %v549_v43, %v546_v32  ;;  %v601_v62 = vmul.f32 -0.5, %v1445_v45  ;;  %v464_v0 = vsub.f32 0.0, %v448_v58  ;;  %v593_v8 = vadd.f32 1.0, %v592_v20 }
 0x114   : > { %1154 = vtanh.f32 %v650_v48  ;;  %v648_v54 = vadd.f32 %v552_v17, %v424_v40  ;;  %v497_v57 = vmul.f32 1.442695, %v466_v39  ;;  %v580_v40 = vadd.f32 1.0, %v1460_v55 }
 0x115   : > { %1156 = vlog2.f32 %v598_v51  ;;  %v493_v5 = vmul.f32 1.442695, %v464_v0  ;;  %v575_v12 = vadd.f32 1.0, %v574_v35  ;;  %v602_v13 = vadd.f32 1.0, %v601_v62 }
 0x116   : > { %1158 = vtanh.f32 %v648_v54  ;;  %v583_v26 = vmul.f32 -0.5, %v1460_v55  ;;  %v594_v7 = vmul.f32 %v1394_v36, %v593_v8  ;;  %vm1476_vm9 = vcmp.lt.f32.partialorder %v595_v10, 0.0004427343 }
 0x117   : > { %1160 = vpow2.f32 %v495_v52  ;;  %v576_v32 = vmul.f32 %v1404_v11, %v575_v12  ;;  %v603_v33 = vmul.f32 %v1445_v45, %v602_v13  ;;  %v430_v36 = vmax.f32 %v1333_v9, 0.0 }
 0x118   : > { %1162 = vpow2.f32 %v491_v56  ;;  %v584_v52 = vadd.f32 1.0, %v583_v26  ;;  %v429_v56 = vmax.f32 %v1325_v59, 0.0  ;;  %v586_v39 = vand.u32 2147483647, %v1460_v55 }
 0x119   : > { %v1141_v60 = vpop.eup %1140  ;;  %1164 = vtanh.f32 %v647_v49  ;;  %v427_v49 = vmax.f32 %v1328_v63, 0.0 }
 0x11a   : > { %v1143_v23 = vpop.eup %1142  ;;  %1166 = vpow2.f32 %v497_v57  ;;  %v678_v2 = vmul.f32 %v1141_v60, %v1301_v29  ;;  %v577_v29 = vand.u32 2147483647, %v1404_v11  ;;  %vm587_vm12 = vcmp.lt.f32.partialorder %v586_v39, 0.0004427343 }
 0x11b   : > { %v1145_v61 = vpop.eup %1144  ;;  %1168 = vlog2.f32 %v580_v40  ;;  %v675_v3 = vmul.f32 %v1143_v23, %v1297_v25  ;;  %v604_v25 = vand.u32 2147483647, %v1445_v45 }
 0x11c   : > { %v1147_v1 = vpop.eup %1146  ;;  %v677_v21 = vmul.f32 %v1145_v61, %v1293_v22  ;;  %1170 = vpow2.f32 %v493_v5  ;;  %vm1486_vm10 = vcmp.lt.f32.partialorder %v577_v29, 0.0004427343 }
 0x11d   : > { %v1149_v19 = vpop.eup %1148  ;;  %v676_v42 = vmul.f32 %v1147_v1, %v1305_v34  ;;  %vm605_vm11 = vcmp.lt.f32.partialorder %v604_v25, 0.0004427343  ;;  %v585_v1 = vmul.f32 %v1460_v55, %v584_v52 }
 0x11e   : > { %v1151_v6 = vpop.eup %1150  ;;  %v692_v16 = vpack.c.bf16 %v678_v2, %v677_v21  ;;  %v591_v24 = vmul.f32 0.6931472, %v1149_v19 }
 0x11f   : > { %v691_v14 = vpack.c.bf16 %v676_v42, %v675_v3  ;;  %v1153_v15 = vpop.eup %1152  ;;  %v573_v34 = vmul.f32 0.6931472, %v1151_v6  ;;  %v428_v3 = vmax.f32 %v1356_v41, 0.0 }
 0x120   : > { %v597_v48 = vsel %vm1476_vm9, %v594_v7, %v591_v24  ;;  %v681_v19 = vmul.f32 %v1153_v15, %v1308_v38 }
 0x121   : > { %v1155_v27 = vpop.eup %1154  ;;  %1040 = vmatprep.mubr.bf16.mxu0 %v691_v14  ;;  %v579_v51 = vsel %vm1486_vm10, %v576_v32, %v573_v34  ;;  %v653_v61 = vadd.f32 %v597_v48, %v429_v56  ;;  %v433_v56 = vmax.f32 %v1424_v4, 0.0 }
 0x122   : > { %v1157_v22 = vpop.eup %1156  ;;  %1041 = vmatmul.mubr.bf16.vlgmr.msra.gmra.mxu0 %v692_v16  ;;  %v682_v20 = vmul.f32 %v1155_v27, %v1316_v47  ;;  %v651_v35 = vadd.f32 %v579_v51, %v427_v49  ;;  %v431_v51 = vmax.f32 %v1430_v18, 0.0 }
 0x123   : > { %v1159_v30 = vpop.eup %1158  ;;  %v600_v43 = vmul.f32 0.6931472, %v1157_v22  ;;  %v434_v22 = vmax.f32 %v1441_v28, 0.0 }
 0x124   : > { %v1482_v46 = vpop.eup %1160  ;;  %v680_v40 = vmul.f32 %v1159_v30, %v1321_v53  ;;  %v694_v6 = vpack.c.bf16 %v682_v20, %v681_v19 }
 0x125   : > { %v1163_v17 = vpop.eup %1162  ;;  %v606_v11 = vsel %vm605_vm11, %v603_v33, %v600_v43  ;;  %v625_v45 = vadd.f32 1.0, %v1482_v46  ;;  %v628_v38 = vmul.f32 -0.5, %v1482_v46  ;;  %v631_v15 = vand.u32 2147483647, %v1482_v46 }
 0x126   : > { %v1165_v54 = vpop.eup %1164  ;;  %v607_v57 = vadd.f32 1.0, %v1163_v17  ;;  %v654_v60 = vadd.f32 %v606_v11, %v430_v36  ;;  %v610_v55 = vmul.f32 -0.5, %v1163_v17  ;;  %v613_v13 = vand.u32 2147483647, %v1163_v17 }
 0x127   : > { %v1167_v58 = vpop.eup %1166  ;;  %1172 = vlog2.f32 %v625_v45  ;;  %v679_v2 = vmul.f32 %v1165_v54, %v1313_v44  ;;  %v629_v12 = vadd.f32 1.0, %v628_v38  ;;  %vm1511_vm14 = vcmp.lt.f32.partialorder %v631_v15, 0.0004427343 }
 0x128   : > { %v1169_v23 = vpop.eup %1168  ;;  %v634_v62 = vadd.f32 1.0, %v1167_v58  ;;  %1174 = vlog2.f32 %v607_v57  ;;  %v637_v44 = vmul.f32 -0.5, %v1167_v58  ;;  %v611_v8 = vadd.f32 1.0, %v610_v55 }
 0x129   : > { %v582_v0 = vmul.f32 0.6931472, %v1169_v23  ;;  %v693_v42 = vpack.c.bf16 %v680_v40, %v679_v2  ;;  %v1171_v5 = vpop.eup %1170  ;;  %v640_v16 = vand.u32 2147483647, %v1167_v58  ;;  %v630_v30 = vmul.f32 %v1482_v46, %v629_v12 }
 0x12a   : > { %1176 = vlog2.f32 %v634_v62  ;;  %v616_v21 = vadd.f32 1.0, %v1171_v5  ;;  %v638_v14 = vadd.f32 1.0, %v637_v44  ;;  %v619_v24 = vmul.f32 -0.5, %v1171_v5 }
 0x12b   : > { %1178 = vtanh.f32 %v654_v60  ;;  %v588_v53 = vsel %vm587_vm12, %v585_v1, %v582_v0  ;;  %1044 = vmatprep.mubr.bf16.mxu1 %v693_v42  ;;  %v612_v26 = vmul.f32 %v1163_v17, %v611_v8  ;;  %vm1507_vm13 = vcmp.lt.f32.partialorder %v613_v13, 0.0004427343 }
 0x12c   : > { %1180 = vtanh.f32 %v651_v35  ;;  %v652_v47 = vadd.f32 %v588_v53, %v428_v3  ;;  %1045 = vmatmul.mubr.bf16.vlgmr.msra.gmra.mxu1 %v694_v6  ;;  %v639_v43 = vmul.f32 %v1167_v58, %v638_v14  ;;  %vm641_vm15 = vcmp.lt.f32.partialorder %v640_v16, 0.0004427343 }
 0x12d   : > { %1182 = vtanh.f32 %v653_v61  ;;  %v620_v36 = vadd.f32 1.0, %v619_v24  ;;  %v622_v52 = vand.u32 2147483647, %v1171_v5  ;;  %v432_v35 = vmax.f32 %v1456_v50, 0.0 }
 0x12e   : > { %1184 = vtanh.f32 %v652_v47 }
 0x12f   : > { %1186 = vlog2.f32 %v616_v21  ;;  %v621_v61 = vmul.f32 %v1171_v5, %v620_v36  ;;  %vm623_vm0 = vcmp.lt.f32.partialorder %v622_v52, 0.0004427343 }
 0x134   : > { %v1173_v10 = vpop.eup %1172 }
 0x135   : > { %v1175_v29 = vpop.eup %1174  ;;  %v627_v25 = vmul.f32 0.6931472, %v1173_v10 }
 0x136   : > { %v609_v34 = vmul.f32 0.6931472, %v1175_v29 }
 0x137   : > { %v1177_v27 = vpop.eup %1176  ;;  %v633_v46 = vsel %vm1511_vm14, %v630_v30, %v627_v25 }
 0x138   : > { %v1179_v7 = vpop.eup %1178  ;;  %v636_v32 = vmul.f32 0.6931472, %v1177_v27  ;;  %v615_v37 = vsel %vm1507_vm13, %v612_v26, %v609_v34  ;;  %v657_v23 = vadd.f32 %v633_v46, %v433_v56 }
 0x139   : > { %v1181_v33 = vpop.eup %1180  ;;  %v686_v54 = vmul.f32 %v1179_v7, %v1333_v9  ;;  %v655_v60 = vadd.f32 %v615_v37, %v431_v51 }
 0x13a   : > { %v1183_v17 = vpop.eup %1182  ;;  %v642_v11 = vsel %vm641_vm15, %v639_v43, %v636_v32  ;;  %v683_v57 = vmul.f32 %v1181_v33, %v1328_v63 }
 0x13b   : > { %v1185_v45 = vpop.eup %1184  ;;  %v658_v49 = vadd.f32 %v642_v11, %v434_v22  ;;  %v685_v40 = vmul.f32 %v1183_v17, %v1325_v59 }
 0x13c   : > { %v1187_v39 = vpop.eup %1186  ;;  %v684_v58 = vmul.f32 %v1185_v45, %v1356_v41 }
 0x13d   : > { %v618_v20 = vmul.f32 0.6931472, %v1187_v39  ;;  %1188 = vtanh.f32 %v658_v49  ;;  %v696_v0 = vpack.c.bf16 %v686_v54, %v685_v40 }
 0x13e   : > { %v695_v62 = vpack.c.bf16 %v684_v58, %v683_v57  ;;  %1190 = vtanh.f32 %v655_v60 }
 0x13f   : > { %v624_v9 = vsel %vm623_vm0, %v621_v61, %v618_v20  ;;  %1192 = vtanh.f32 %v657_v23 }
 0x140   : > { %v656_v1 = vadd.f32 %v624_v9, %v432_v35  ;;  %1048 = vmatprep.mubr.bf16.mxu1 %v695_v62 }
 0x141   : > { %1049 = vmatmul.mubr.bf16.gmra.mxu1 %v696_v0 }
 0x142   : > { %1194 = vtanh.f32 %v656_v1 }
 0x14a   : > { %v1189_v63 = vpop.eup %1188 }
 0x14b   : > { %v1191_v41 = vpop.eup %1190  ;;  %v690_v19 = vmul.f32 %v1189_v63, %v1441_v28 }
 0x14c   : > { %v1193_v59 = vpop.eup %1192  ;;  %v687_v3 = vmul.f32 %v1191_v41, %v1430_v18 }
 0x14d   : > { %v689_v42 = vmul.f32 %v1193_v59, %v1424_v4 }
 0x14f   : > { %v1195_v2 = vpop.eup %1194  ;;  %v698_v47 = vpack.c.bf16 %v690_v19, %v689_v42 }
 0x150   : > { %v688_v53 = vmul.f32 %v1195_v2, %v1456_v50 }
 0x152   : > { %v697_v5 = vpack.c.bf16 %v688_v53, %v687_v3 }
 0x154   : > { %1052 = vmatprep.mubr.bf16.mxu1 %v697_v5 }
 0x155   : > { %1053 = vmatmul.mubr.bf16.gmra.mxu1 %v698_v47 }
 0x1e2   : > { %v1042_v18 = vpop.f32.mrf.mxu0 }
 0x1e3   : > { %862 = vst [vmem:[%s1534_s27 + $0x10] sm:$0xff] %v1042_v18 }
 0x1e4   : > { %v797_v4 = vpop.f32.mrf.mxu0 }
 0x1e5   : > { %860 = vst [vmem:[%s1534_s27] sm:$0xff] %v797_v4 }
 0x1e6   : > { %v1043_v28 = vpop.f32.mrf.mxu0 }
 0x1e7   : > { %863 = vst [vmem:[%s1534_s27 + $0x18] sm:$0xff] %v1043_v28 }
 0x1e8   : > { %v800_v50 = vpop.f32.mrf.mxu0 }
 0x1e9   : > { %861 = vst [vmem:[%s1534_s27 + $0x8] sm:$0xff] %v800_v50 }
 0x1ec   : > { %v1046_v6 = vpop.f32.mrf.mxu1 }
 0x1ed   : > { %866 = vst [vmem:[%s1534_s27 + $0x30] sm:$0xff] %v1046_v6 }
 0x1ee   : > { %v813_v21 = vpop.f32.mrf.mxu1 }
 0x1ef   : > { %864 = vst [vmem:[%s1534_s27 + $0x20] sm:$0xff] %v813_v21 }
 0x1f0   : > { %v1047_v55 = vpop.f32.mrf.mxu1 }
 0x1f1   : > { %867 = vst [vmem:[%s1534_s27 + $0x38] sm:$0xff] %v1047_v55 }
 0x1f2   : > { %v816_v38 = vpop.f32.mrf.mxu1 }
 0x1f3   : > { %865 = vst [vmem:[%s1534_s27 + $0x28] sm:$0xff] %v816_v38 }
 0x201   : > { %v1050_v44 = vpop.f32.mrf.mxu1 }
 0x202   : > { %870 = vst [vmem:[%s1534_s27 + $0x50] sm:$0xff] %v1050_v44 }
 0x203   : > { %v829_v8 = vpop.f32.mrf.mxu1 }
 0x204   : > { %868 = vst [vmem:[%s1534_s27 + $0x40] sm:$0xff] %v829_v8 }
 0x205   : > { %v1051_v10 = vpop.f32.mrf.mxu1 }
 0x206   : > { %871 = vst [vmem:[%s1534_s27 + $0x58] sm:$0xff] %v1051_v10 }
 0x207   : > { %v832_v12 = vpop.f32.mrf.mxu1 }
 0x208   : > { %869 = vst [vmem:[%s1534_s27 + $0x48] sm:$0xff] %v832_v12 }
 0x215   : > { %v1054_v13 = vpop.f32.mrf.mxu1 }
 0x216   : > { %874 = vst [vmem:[%s1534_s27 + $0x70] sm:$0xff] %v1054_v13 }
 0x217   : > { %v845_v14 = vpop.f32.mrf.mxu1 }
 0x218   : > { %872 = vst [vmem:[%s1534_s27 + $0x60] sm:$0xff] %v845_v14 }
 0x219   : > { %v1055_v15 = vpop.f32.mrf.mxu1 }
 0x21a   : > { %875 = vst [vmem:[%s1534_s27 + $0x78] sm:$0xff] %v1055_v15 }
 0x21b   : > { %v848_v16 = vpop.f32.mrf.mxu1 }
 0x21c   : > { %873 = vst [vmem:[%s1534_s27 + $0x68] sm:$0xff] %v848_v16 }
 0x21d PF: > { %s14_s15 = sadd.s32 1, %s1202_s15  }
 0x21e   : > { %p11_p4 = scmp.ge.s32.totalorder %s14_s15, 4  }
 0x220   :  { %13 = sbr.rel (!%p11_p4) target bundleno = 1 (0x1), region = 66 }

</bundles_post_ra>
